<compile_context>
chip_gen: v5e
topology: v5e:2x2
jax: 0.10.0
libtpu: 0.0.40
codegen_flags: <defaults>
</compile_context>

<pallas_src>
import functools

import jax
import jax.numpy as jnp
from jax.experimental import pallas as pl
from jax.experimental.pallas import tpu as pltpu

_LANE = 128
_SUBL = 8
_MAX_BLOCK_ROWS = 1024  # 1024x128 f32 = 512 KiB per block


def _bce_partial_kernel(o_ref, m_ref, partial_ref, *, total_rows, block_rows):
    i = pl.program_id(0)

    p = o_ref[...].astype(jnp.float32)
    m = m_ref[...].astype(jnp.float32)

    # Mask the row-overhang of the last (partial) block: force (p=1, m=1),
    # which contributes exactly 0 loss and keeps log() NaN-free on stale VMEM.
    row = jax.lax.broadcasted_iota(jnp.int32, (block_rows, _LANE), 0)
    valid = (i * block_rows + row) < total_rows
    p = jnp.where(valid, p, 1.0)
    m = jnp.where(valid, m, 1.0)

    # PyTorch BCELoss clamps the log terms at -100.
    log_p = jnp.maximum(jnp.log(p), -100.0)
    log_1mp = jnp.maximum(jnp.log(1.0 - p), -100.0)
    # -(m*log_p + (1-m)*log_1mp), rearranged to save a mul+sub per element.
    term = -(log_1mp + m * (log_p - log_1mp))

    # Fold this block into a vreg-shaped (8, 128) per-lane partial sum: pure
    # VPU adds in the hot loop (no per-step XLU cross-lane reduce).
    partial_ref[...] = term.reshape(block_rows // _SUBL, _SUBL, _LANE).sum(axis=0)


def bce_loss(output, mask):
    """Mean binary cross-entropy, matching nn.BCELoss() (mean reduction)."""
    assert output.shape == mask.shape
    n = output.size

    flat_o = output.reshape(-1)
    flat_m = mask.reshape(-1)

    # Only pad the lane tail when n % 128 != 0 (pad values (p=1, m=1) contribute
    # exactly 0).  Common segmentation shapes hit the no-pad path.
    # TODO(synk): handle a non-128-divisible tail fully in-kernel to avoid this copy.
    rem = n % _LANE
    if rem:
        pad = _LANE - rem
        flat_o = jnp.concatenate([flat_o, jnp.ones((pad,), flat_o.dtype)])
        flat_m = jnp.concatenate([flat_m, jnp.ones((pad,), flat_m.dtype)])

    rows = flat_o.size // _LANE
    o2 = flat_o.reshape(rows, _LANE)
    m2 = flat_m.reshape(rows, _LANE)

    block_rows = min(_MAX_BLOCK_ROWS, pl.cdiv(rows, _SUBL) * _SUBL)
    num_blocks = pl.cdiv(rows, block_rows)

    kernel = functools.partial(
        _bce_partial_kernel, total_rows=rows, block_rows=block_rows)

    bytes_in = (output.size * output.dtype.itemsize
                + mask.size * mask.dtype.itemsize)
    cost = pl.CostEstimate(
        flops=8 * n,
        transcendentals=2 * n,
        bytes_accessed=int(bytes_in + num_blocks * _SUBL * _LANE * 4),
    )

    partials = pl.pallas_call(
        kernel,
        out_shape=jax.ShapeDtypeStruct((num_blocks * _SUBL, _LANE), jnp.float32),
        grid=(num_blocks,),
        in_specs=[
            pl.BlockSpec((block_rows, _LANE), lambda i: (i, 0)),
            pl.BlockSpec((block_rows, _LANE), lambda i: (i, 0)),
        ],
        out_specs=pl.BlockSpec((_SUBL, _LANE), lambda i: (i, 0)),
        compiler_params=pltpu.CompilerParams(
            dimension_semantics=("parallel",),
        ),
        cost_estimate=cost,
    )(o2, m2)

    # Single tiny cross-lane reduction + normalization by the true element count.
    return jnp.sum(partials) / jnp.float32(n)


if __name__ == "__main__":
    key = jax.random.PRNGKey(0)
    k1, k2 = jax.random.split(key)

    # Small NCHW shapes consistent with a segmentation-style BCE loss.
    shape = (2, 4, 16, 16)
    # output must be probabilities in (0, 1); mask is a binary target.
    output = jax.nn.sigmoid(jax.random.normal(k1, shape, dtype=jnp.float32))
    mask = (jax.random.uniform(k2, shape) > 0.5).astype(jnp.float32)

    loss = jax.block_until_ready(bce_loss(output, mask))

    # Reference check (plain JAX, same clamped-log semantics as PyTorch).
    ref = jnp.mean(
        -(mask * jnp.maximum(jnp.log(output), -100.0)
          + (1.0 - mask) * jnp.maximum(jnp.log(1.0 - output), -100.0))
    )
    assert jnp.allclose(loss, ref, rtol=1e-5, atol=1e-6), (loss, ref)

    print("KERNEL_OK")
</pallas_src>

<mosaic_0001>
module attributes {stable_mosaic.version = 11 : i64} {
  func.func @_bce_partial_kernel(%arg0: i32, %arg1: memref<16x128xf32, #tpu.memory_space<vmem>>, %arg2: memref<16x128xf32, #tpu.memory_space<vmem>>, %arg3: memref<8x128xf32, #tpu.memory_space<vmem>>) attributes {dimension_semantics = [#tpu.dimension_semantics<parallel>], iteration_bounds = array<i64: 1>, scalar_prefetch = 0 : i64, scratch_operands = 0 : i64, tpu.core_type = #tpu.core_type<tc>, window_params = [{transform_indices = @transform_0, window_bounds = array<i64: 16, 128>}, {transform_indices = @transform_1, window_bounds = array<i64: 16, 128>}, {transform_indices = @transform_2, window_bounds = array<i64: 8, 128>}]} {
    %c0 = arith.constant 0 : index
    %c0_0 = arith.constant 0 : index
    %0 = vector.load %arg1[%c0, %c0_0] : memref<16x128xf32, #tpu.memory_space<vmem>>, vector<16x128xf32>
    %c0_1 = arith.constant 0 : index
    %c0_2 = arith.constant 0 : index
    %1 = vector.load %arg2[%c0_1, %c0_2] : memref<16x128xf32, #tpu.memory_space<vmem>>, vector<16x128xf32>
    %2 = tpu.iota {dimensions = array<i32: 0>} : vector<16x128xi32>
    %c16_i32 = arith.constant 16 : i32
    %3 = arith.muli %arg0, %c16_i32 : i32
    %4 = vector.broadcast %3 : i32 to vector<16x128xi32>
    %5 = arith.addi %4, %2 : vector<16x128xi32>
    %c16_i32_3 = arith.constant 16 : i32
    %6 = vector.broadcast %c16_i32_3 : i32 to vector<16x128xi32>
    %7 = arith.cmpi slt, %5, %6 : vector<16x128xi32>
    %cst = arith.constant 1.000000e+00 : f32
    %8 = vector.broadcast %cst : f32 to vector<16x128xf32>
    %9 = arith.select %7, %0, %8 : vector<16x128xi1>, vector<16x128xf32>
    %cst_4 = arith.constant 1.000000e+00 : f32
    %10 = vector.broadcast %cst_4 : f32 to vector<16x128xf32>
    %11 = arith.select %7, %1, %10 : vector<16x128xi1>, vector<16x128xf32>
    %12 = math.log %9 : vector<16x128xf32>
    %cst_5 = arith.constant -1.000000e+02 : f32
    %13 = vector.broadcast %cst_5 : f32 to vector<16x128xf32>
    %14 = arith.maximumf %12, %13 : vector<16x128xf32>
    %cst_6 = arith.constant 1.000000e+00 : f32
    %15 = vector.broadcast %cst_6 : f32 to vector<16x128xf32>
    %16 = arith.subf %15, %9 : vector<16x128xf32>
    %17 = math.log %16 : vector<16x128xf32>
    %cst_7 = arith.constant -1.000000e+02 : f32
    %18 = vector.broadcast %cst_7 : f32 to vector<16x128xf32>
    %19 = arith.maximumf %17, %18 : vector<16x128xf32>
    %20 = arith.subf %14, %19 : vector<16x128xf32>
    %21 = arith.mulf %11, %20 : vector<16x128xf32>
    %22 = arith.addf %19, %21 : vector<16x128xf32>
    %cst_8 = arith.constant 0.000000e+00 : f32
    %23 = vector.broadcast %cst_8 : f32 to vector<16x128xf32>
    %24 = arith.subf %23, %22 : vector<16x128xf32>
    %25 = vector.shape_cast %24 : vector<16x128xf32> to vector<2x8x128xf32>
    %cst_9 = arith.constant dense<0.000000e+00> : vector<8x128xf32>
    %26 = vector.multi_reduction <add>, %25, %cst_9 [0] : vector<2x8x128xf32> to vector<8x128xf32>
    %c0_10 = arith.constant 0 : index
    %c0_11 = arith.constant 0 : index
    %27 = vector.load %arg3[%c0_10, %c0_11] : memref<8x128xf32, #tpu.memory_space<vmem>>, vector<8x128xf32>
    tpu.vector_store %arg3[%c0_10, %c0_11], %26 {strides = array<i32>} : memref<8x128xf32, #tpu.memory_space<vmem>>, vector<8x128xf32>,
    return
  }
  func.func @transform_0(%arg0: i32) -> (i32, i32) {
    %c0_i32 = arith.constant 0 : i32
    %c0_i32_0 = arith.constant 0 : i32
    return %arg0, %c0_i32 : i32, i32
  }
  func.func @transform_1(%arg0: i32) -> (i32, i32) {
    %c0_i32 = arith.constant 0 : i32
    %c0_i32_0 = arith.constant 0 : i32
    return %arg0, %c0_i32 : i32, i32
  }
  func.func @transform_2(%arg0: i32) -> (i32, i32) {
    %c0_i32 = arith.constant 0 : i32
    %c0_i32_0 = arith.constant 0 : i32
    return %arg0, %c0_i32 : i32, i32
  }
}

</mosaic_0001>

<bundles_post_ra>
// kernel: tpu_custom_call.1
= control target key start
LH: loop header
LB: loop body
LE: loop exit
PB: predicated region body
PF: predicated region fallthrough
CT: control target
= control target key end

     0   :  { %7 = vsyncpa [#allocation3], 0  ;;  %s223_s0 = inlined_call_operand.hbm [shape: f32[16,128], index: 0, kind: input, shape index: {}]   ;;  %s224_s1 = inlined_call_operand.hbm [shape: f32[16,128], index: 1, kind: input, shape index: {}]   ;;  %s225_s2 = inlined_call_operand.hbm [shape: f32[8,128], index: 2, kind: output, shape index: {}]  }
   0x1   :  { %8 = vsyncpa [#allocation6], 0 }
   0x2   :  { %9 = vsyncpa [#allocation4], 0  ;;  %s14_s11 = sshll.u32 %s223_s0, 4  ;;  %s194_s12 = smov [#allocation2]   ;;  %s15_s11 = int_to_ptr.hbm [resolvable:$true] %s14_s11 }
   0x3   :  { %s16_s13 = sshll.u32 %s194_s12, 4  ;;  %s27_s16 = sshll.u32 %s224_s1, 4  ;;  %s17_s13 = int_to_ptr.vmem [resolvable:$true] %s16_s13  ;;  %s28_s16 = int_to_ptr.hbm [resolvable:$true] %s27_s16 }
   0x4   :  { %s195_s17 = smov 128   ;;  %s196_s18 = smov 8  }
   0x5   :  { %22 = dma.hbm_to_vmem [thread:$0]  %s15_s11, 256, %s17_s13, [#allocation3], %s195_s17, %s195_s17, %s196_s18  }
   0x6   :  { %s197_s19 = smov [#allocation5]  }
   0x7   :  { %s29_s20 = sshll.u32 %s197_s19, 4  ;;  %s30_s20 = int_to_ptr.vmem [resolvable:$true] %s29_s20 }
   0x8   :  { %35 = dma.hbm_to_vmem [thread:$0]  %s28_s16, 256, %s30_s20, [#allocation6], %s195_s17, %s195_s17, %s196_s18  }
   0x9   :  { %188 = dma.done.wait [#allocation3], 256  }
   0xa   :  { %189 = vsyncadd [#allocation3], 4294967040 }
   0xb   :  { %190 = dma.done.wait [#allocation6], 256  }
   0xc   :  { %191 = vsyncadd [#allocation6], 4294967040  ;;  %v44_v0 = vld [vmem:[#allocation2] sm:$0xff]  ;;  %v45_v1 = vld [vmem:[#allocation2 + $0x8] sm:$0xff]  ;;  %s198_s0 = smov [#allocation7]   ;;  %s92_s23 = sshll.u32 %s225_s2, 4  ;;  %s93_s23 = int_to_ptr.hbm [resolvable:$true] %s92_s23 }
   0xd   :  { %108 = vlog2.f32 %v44_v0  ;;  %v67_v2 = vsub.f32 1.0, %v44_v0  ;;  %v68_v3 = vsub.f32 1.0, %v45_v1  ;;  %v46_v15 = vld [vmem:[#allocation5] sm:$0xff]  ;;  %v47_v17 = vld [vmem:[#allocation5 + $0x8] sm:$0xff]  ;;  %s90_s1 = sshll.u32 %s198_s0, 4  ;;  %s91_s1 = int_to_ptr.vmem [resolvable:$true] %s90_s1 }
   0xe   :  { %110 = vlog2.f32 %v45_v1 }
   0xf   :  { %112 = vlog2.f32 %v67_v2 }
  0x10   :  { %114 = vlog2.f32 %v68_v3 }
  0x13   :  { %v109_v4 = vpop.eup %108 }
  0x14   :  { %v111_v5 = vpop.eup %110  ;;  %v62_v6 = vmul.f32 0.6931472, %v109_v4 }
  0x15   :  { %v113_v7 = vpop.eup %112  ;;  %v64_v8 = vmul.f32 0.6931472, %v111_v5 }
  0x16   :  { %v115_v9 = vpop.eup %114  ;;  %v65_v10 = vmax.f32 %v62_v6, -100.0  ;;  %v70_v11 = vmul.f32 0.6931472, %v113_v7 }
  0x17   :  { %v66_v12 = vmax.f32 %v64_v8, -100.0  ;;  %v72_v13 = vmul.f32 0.6931472, %v115_v9 }
  0x18   :  { %v73_v14 = vmax.f32 %v70_v11, -100.0 }
  0x19   :  { %v74_v16 = vmax.f32 %v72_v13, -100.0 }
  0x1a   :  { %v75_v18 = vsub.f32 %v65_v10, %v73_v14 }
  0x1b   :  { %v76_v19 = vsub.f32 %v66_v12, %v74_v16 }
  0x1c   :  { %v77_v20 = vmul.f32 %v75_v18, %v46_v15 }
  0x1d   :  { %v78_v21 = vmul.f32 %v76_v19, %v47_v17 }
  0x1e   :  { %v79_v22 = vadd.f32 %v77_v20, %v73_v14 }
  0x1f   :  { %v80_v23 = vadd.f32 %v78_v21, %v74_v16 }
  0x20   :  { %v81_v24 = vsub.f32 0.0, %v79_v22 }
  0x21   :  { %v82_v25 = vsub.f32 0.0, %v80_v23 }
  0x23   :  { %v83_v26 = vadd.f32 %v82_v25, %v81_v24 }
  0x25   :  { %84 = vst [vmem:[#allocation7] sm:$0xff] %v83_v26 }
  0x26   :  { %95 = dma.vmem_to_hbm [thread:$0]  %s91_s1, 128, %s93_s23, [#allocation4]  }
  0x27   :  { %192 = dma.done.wait [#allocation4], 128  }
  0x28   :  { %193 = vsyncadd [#allocation4], 4294967168 }
  0x29   :  { %100 = vsyncpa [#allocation3], 1 }
  0x2a   :  { %101 = vsyncpa [#allocation6], 1 }
  0x2b   :  { %102 = vsyncpa [#allocation4], 1 }

</bundles_post_ra>
